<compile_context>
chip_gen: v7x
topology: tpu7x:2x2x1
jax: 0.10.0
libtpu: 0.0.40
codegen_flags: <defaults>
</compile_context>

<pallas_src>
import functools

import jax
import jax.numpy as jnp
from jax.experimental import pallas as pl
from jax.experimental.pallas import tpu as pltpu

_LANES = 128


def _elementwise_masked_loss(pred, tgt, mask, *, loss_type, reduction):
    """Element-wise loss math shared by the Pallas kernel and the JAX tail."""
    pred = pred.astype(jnp.float32)
    tgt = tgt.astype(jnp.float32)
    maskf = mask.astype(jnp.float32)

    diff = pred - tgt
    if loss_type == "huber":
        # nn.HuberLoss(delta=1.0): 0.5*d^2 if |d|<=1 else |d|-0.5
        absd = jnp.abs(diff)
        loss = jnp.where(absd <= 1.0, 0.5 * diff * diff, absd - 0.5)
    elif loss_type == "mae":
        loss = jnp.abs(diff)
    else:  # mse
        loss = diff * diff

    if reduction == "weighted":
        loss = loss * (1.0 + jnp.abs(tgt) * 0.02)  # == |tgt|/50, single VPU mul

    # Keep exact `loss * mask` semantics for any non-zero mask value, but make
    # masked-out positions immune to NaN/Inf garbage in pred/target.
    masked = jnp.where(maskf != 0.0, loss * maskf, 0.0)
    return masked, maskf


def _nmr_loss_kernel(pred_ref, tgt_ref, mask_ref, out_ref, *,
                     loss_type: str, reduction: str):
    """One (tile_rows, 128) lane-dense tile -> two (1,128) column-sum vectors.

    out block is (1, 2, 128):
      row 0: sum over rows of masked loss (per lane column)
      row 1: sum over rows of mask        (per lane column)
    The H/C channel split (lane parity) is finished in the JAX epilogue.
    """
    masked, maskf = _elementwise_masked_loss(
        pred_ref[...], tgt_ref[...], mask_ref[...],
        loss_type=loss_type, reduction=reduction)

    out_ref[0, 0:1, :] = jnp.sum(masked, axis=0, keepdims=True)
    out_ref[0, 1:2, :] = jnp.sum(maskf, axis=0, keepdims=True)


def simplified_nmr_loss(pred_shifts, target_shifts, nmr_mask, *,
                        nmr_loss_type: str = "huber",
                        nmr_loss_reduction: str = "weighted",
                        max_tile_rows: int = 2048):
    """JAX/Pallas equivalent of SimplifiedNMRLoss.forward.

    pred_shifts, target_shifts, nmr_mask: arrays of shape [B, S, 2]
    (channel 0 = H shifts, channel 1 = C shifts).  Any float/bool/int dtype is
    accepted; passing bf16 shifts and a bool/int8 mask cuts HBM traffic.
    Returns a dict of scalar float32 losses.
    """
    assert pred_shifts.shape == target_shifts.shape == nmr_mask.shape
    assert pred_shifts.ndim == 3 and pred_shifts.shape[-1] == 2

    n = pred_shifts.size
    pred_f = pred_shifts.reshape(-1)     # free bitcast reshapes
    tgt_f = target_shifts.reshape(-1)
    mask_f = nmr_mask.reshape(-1)

    rows = n // _LANES
    max_tile_rows = max(8, (max_tile_rows // 8) * 8)

    # Tiling: distribute rows evenly over tiles so padding waste is never
    # streamed; the (small) remainder is handled in plain JAX.
    if rows >= 8:
        num_tiles = pl.cdiv(rows, max_tile_rows)
        tile_rows = ((rows // num_tiles) // 8) * 8
        if tile_rows < 8:           # pathological small max_tile_rows
            tile_rows = 8
            num_tiles = rows // 8
        rows_main = num_tiles * tile_rows
    else:
        num_tiles = 0
        tile_rows = 0
        rows_main = 0
    n_main = rows_main * _LANES

    # Accumulated partial sums: [h_loss_sum, c_loss_sum, h_mask_sum, c_mask_sum]
    sums = jnp.zeros((4,), jnp.float32)

    if num_tiles > 0:
        def _as_rows(x):
            if n == rows * _LANES:              # 128-aligned: zero-copy view
                return x.reshape(rows, _LANES)
            # Non-aligned sizes pay one prefix-slice copy of the kernel region.
            return x[:n_main].reshape(rows_main, _LANES)

        pred2 = _as_rows(pred_f)
        tgt2 = _as_rows(tgt_f)
        mask2 = _as_rows(mask_f)

        kernel = functools.partial(
            _nmr_loss_kernel,
            loss_type=nmr_loss_type,
            reduction=nmr_loss_reduction,
        )

        in_spec = pl.BlockSpec((tile_rows, _LANES), lambda i: (i, 0))

        tile_bytes = (pred2.dtype.itemsize + tgt2.dtype.itemsize
                      + mask2.dtype.itemsize) * tile_rows * _LANES
        # Double-buffered inputs + slack; stays within every generation's
        # physical VMEM while allowing large tiles to be swept.
        vmem_limit = int(min(48 << 20, max(16 << 20, 2 * tile_bytes + (2 << 20))))

        partials = pl.pallas_call(
            kernel,
            out_shape=jax.ShapeDtypeStruct((num_tiles, 2, _LANES), jnp.float32),
            grid_spec=pltpu.PrefetchScalarGridSpec(
                num_scalar_prefetch=0,
                grid=(num_tiles,),
                in_specs=[in_spec, in_spec, in_spec],
                out_specs=pl.BlockSpec((1, 2, _LANES), lambda i: (i, 0, 0)),
            ),
            compiler_params=pltpu.CompilerParams(
                dimension_semantics=("parallel",),
                vmem_limit_bytes=vmem_limit,
            ),
        )(pred2, tgt2, mask2)

        # Tiny cross-tile reduce + lane-parity channel split in plain JAX.
        # flat index = row*128 + lane, channel = flat % 2 = lane % 2 (128 even).
        col_loss = jnp.sum(partials[:, 0, :], axis=0)   # (128,)
        col_mask = jnp.sum(partials[:, 1, :], axis=0)   # (128,)
        sums = sums + jnp.stack([
            jnp.sum(col_loss[0::2]), jnp.sum(col_loss[1::2]),
            jnp.sum(col_mask[0::2]), jnp.sum(col_mask[1::2])])

    if n_main < n:
        # Remainder (< tile worth of rows + sub-128 tail): plain JAX, tiny.
        t_masked, t_maskf = _elementwise_masked_loss(
            pred_f[n_main:], tgt_f[n_main:], mask_f[n_main:],
            loss_type=nmr_loss_type, reduction=nmr_loss_reduction)
        t_masked = t_masked.reshape(-1, 2)   # n and n_main are both even
        t_maskf = t_maskf.reshape(-1, 2)
        sums = sums + jnp.stack([
            jnp.sum(t_masked[:, 0]), jnp.sum(t_masked[:, 1]),
            jnp.sum(t_maskf[:, 0]), jnp.sum(t_maskf[:, 1])])

    h_sum, c_sum, h_mask_sum, c_mask_sum = sums[0], sums[1], sums[2], sums[3]
    masked_sum = h_sum + c_sum
    num_valid = h_mask_sum + c_mask_sum

    total_loss = jnp.where(num_valid > 0, masked_sum / num_valid,
                           jnp.float32(0.0))
    h_loss = h_sum / (h_mask_sum + 1e-6)
    c_loss = c_sum / (c_mask_sum + 1e-6)

    return {
        "total_loss": total_loss,
        "nmr_loss": total_loss,
        "h_nmr_loss": h_loss,
        "c_nmr_loss": c_loss,
    }


def _reference(pred, tgt, mask, loss_type="huber", reduction="weighted"):
    """Pure-JAX replica of the PyTorch module for checking."""
    diff = pred - tgt
    if loss_type == "huber":
        absd = jnp.abs(diff)
        loss = jnp.where(absd <= 1.0, 0.5 * diff * diff, absd - 0.5)
    elif loss_type == "mae":
        loss = jnp.abs(diff)
    else:
        loss = diff * diff
    if reduction == "weighted":
        loss = loss * (1.0 + jnp.abs(tgt) / 50.0)
    masked = loss * mask
    nv = mask.sum()
    total = jnp.where(nv > 0, masked.sum() / nv, jnp.float32(0.0))
    h = masked[:, :, 0].sum() / (mask[:, :, 0].sum() + 1e-6)
    c = masked[:, :, 1].sum() / (mask[:, :, 1].sum() + 1e-6)
    return total, h, c


if __name__ == "__main__":
    key = jax.random.PRNGKey(0)

    # (B, S) cases: 128-aligned zero-copy path (kernel + row tail),
    # non-aligned path (kernel + prefix slice + tail), and tiny pure-JAX path.
    cases = [(2, 288), (3, 200), (2, 8)]

    for idx, (B, S) in enumerate(cases):
        key, k1, k2, k3 = jax.random.split(key, 4)
        pred = jax.random.normal(k1, (B, S, 2), dtype=jnp.float32) * 5.0
        tgt = jax.random.normal(k2, (B, S, 2), dtype=jnp.float32) * 5.0
        mask = (jax.random.uniform(k3, (B, S, 2)) > 0.3).astype(jnp.float32)

        out = simplified_nmr_loss(pred, tgt, mask,
                                  nmr_loss_type="huber",
                                  nmr_loss_reduction="weighted")
        jax.block_until_ready(out)

        ref_total, ref_h, ref_c = _reference(pred, tgt, mask)
        assert jnp.allclose(out["total_loss"], ref_total, rtol=1e-4, atol=1e-5), idx
        assert jnp.allclose(out["nmr_loss"], ref_total, rtol=1e-4, atol=1e-5), idx
        assert jnp.allclose(out["h_nmr_loss"], ref_h, rtol=1e-4, atol=1e-5), idx
        assert jnp.allclose(out["c_nmr_loss"], ref_c, rtol=1e-4, atol=1e-5), idx

    print("KERNEL_OK")
</pallas_src>

<mosaic_0001>
module attributes {stable_mosaic.version = 11 : i64} {
  func.func @_nmr_loss_kernel(%arg0: i32, %arg1: memref<8x128xf32, #tpu.memory_space<vmem>>, %arg2: memref<8x128xf32, #tpu.memory_space<vmem>>, %arg3: memref<8x128xf32, #tpu.memory_space<vmem>>, %arg4: memref<1x2x128xf32, #tpu.memory_space<vmem>>) attributes {dimension_semantics = [#tpu.dimension_semantics<parallel>], iteration_bounds = array<i64: 1>, scalar_prefetch = 0 : i64, scratch_operands = 0 : i64, tpu.core_type = #tpu.core_type<tc>, window_params = [{transform_indices = @transform_0, window_bounds = array<i64: 8, 128>}, {transform_indices = @transform_1, window_bounds = array<i64: 8, 128>}, {transform_indices = @transform_2, window_bounds = array<i64: 8, 128>}, {transform_indices = @transform_3, window_bounds = array<i64: 1, 2, 128>}]} {
    %c0 = arith.constant 0 : index
    %c0_0 = arith.constant 0 : index
    %0 = vector.load %arg1[%c0, %c0_0] : memref<8x128xf32, #tpu.memory_space<vmem>>, vector<8x128xf32>
    %c0_1 = arith.constant 0 : index
    %c0_2 = arith.constant 0 : index
    %1 = vector.load %arg2[%c0_1, %c0_2] : memref<8x128xf32, #tpu.memory_space<vmem>>, vector<8x128xf32>
    %c0_3 = arith.constant 0 : index
    %c0_4 = arith.constant 0 : index
    %2 = vector.load %arg3[%c0_3, %c0_4] : memref<8x128xf32, #tpu.memory_space<vmem>>, vector<8x128xf32>
    %3 = arith.subf %0, %1 : vector<8x128xf32>
    %4 = math.absf %3 : vector<8x128xf32>
    %cst = arith.constant 1.000000e+00 : f32
    %5 = vector.broadcast %cst : f32 to vector<8x128xf32>
    %6 = arith.cmpf ole, %4, %5 : vector<8x128xf32>
    %cst_5 = arith.constant 5.000000e-01 : f32
    %7 = vector.broadcast %cst_5 : f32 to vector<8x128xf32>
    %8 = arith.mulf %7, %3 : vector<8x128xf32>
    %9 = arith.mulf %8, %3 : vector<8x128xf32>
    %cst_6 = arith.constant 5.000000e-01 : f32
    %10 = vector.broadcast %cst_6 : f32 to vector<8x128xf32>
    %11 = arith.subf %4, %10 : vector<8x128xf32>
    %12 = arith.select %6, %9, %11 : vector<8x128xi1>, vector<8x128xf32>
    %13 = math.absf %1 : vector<8x128xf32>
    %cst_7 = arith.constant 2.000000e-02 : f32
    %14 = vector.broadcast %cst_7 : f32 to vector<8x128xf32>
    %15 = arith.mulf %13, %14 : vector<8x128xf32>
    %cst_8 = arith.constant 1.000000e+00 : f32
    %16 = vector.broadcast %cst_8 : f32 to vector<8x128xf32>
    %17 = arith.addf %16, %15 : vector<8x128xf32>
    %18 = arith.mulf %12, %17 : vector<8x128xf32>
    %cst_9 = arith.constant 0.000000e+00 : f32
    %19 = vector.broadcast %cst_9 : f32 to vector<8x128xf32>
    %20 = arith.cmpf one, %2, %19 : vector<8x128xf32>
    %21 = arith.mulf %18, %2 : vector<8x128xf32>
    %cst_10 = arith.constant 0.000000e+00 : f32
    %22 = vector.broadcast %cst_10 : f32 to vector<8x128xf32>
    %23 = arith.select %20, %21, %22 : vector<8x128xi1>, vector<8x128xf32>
    %cst_11 = arith.constant dense<0.000000e+00> : vector<128xf32>
    %24 = vector.multi_reduction <add>, %23, %cst_11 [0] : vector<8x128xf32> to vector<128xf32>
    %25 = vector.shape_cast %24 : vector<128xf32> to vector<1x128xf32>
    %c0_12 = arith.constant 0 : index
    %c0_13 = arith.constant 0 : index
    %c0_14 = arith.constant 0 : index
    %26 = vector.load %arg4[%c0_12, %c0_13, %c0_14] : memref<1x2x128xf32, #tpu.memory_space<vmem>>, vector<1x1x128xf32>
    %27 = vector.shape_cast %26 : vector<1x1x128xf32> to vector<1x128xf32>
    %28 = vector.shape_cast %25 : vector<1x128xf32> to vector<1x1x128xf32>
    tpu.vector_store %arg4[%c0_12, %c0_13, %c0_14], %28 {strides = array<i32>} : memref<1x2x128xf32, #tpu.memory_space<vmem>>, vector<1x1x128xf32>,
    %cst_15 = arith.constant dense<0.000000e+00> : vector<128xf32>
    %29 = vector.multi_reduction <add>, %2, %cst_15 [0] : vector<8x128xf32> to vector<128xf32>
    %30 = vector.shape_cast %29 : vector<128xf32> to vector<1x128xf32>
    %c0_16 = arith.constant 0 : index
    %c1 = arith.constant 1 : index
    %c0_17 = arith.constant 0 : index
    %31 = vector.load %arg4[%c0_16, %c1, %c0_17] : memref<1x2x128xf32, #tpu.memory_space<vmem>>, vector<1x1x128xf32>
    %32 = vector.shape_cast %31 : vector<1x1x128xf32> to vector<1x128xf32>
    %33 = vector.shape_cast %30 : vector<1x128xf32> to vector<1x1x128xf32>
    tpu.vector_store %arg4[%c0_16, %c1, %c0_17], %33 {strides = array<i32>} : memref<1x2x128xf32, #tpu.memory_space<vmem>>, vector<1x1x128xf32>,
    return
  }
  func.func @transform_0(%arg0: i32) -> (i32, i32) {
    %c0_i32 = arith.constant 0 : i32
    %c0_i32_0 = arith.constant 0 : i32
    return %arg0, %c0_i32 : i32, i32
  }
  func.func @transform_1(%arg0: i32) -> (i32, i32) {
    %c0_i32 = arith.constant 0 : i32
    %c0_i32_0 = arith.constant 0 : i32
    return %arg0, %c0_i32 : i32, i32
  }
  func.func @transform_2(%arg0: i32) -> (i32, i32) {
    %c0_i32 = arith.constant 0 : i32
    %c0_i32_0 = arith.constant 0 : i32
    return %arg0, %c0_i32 : i32, i32
  }
  func.func @transform_3(%arg0: i32) -> (i32, i32, i32) {
    %c0_i32 = arith.constant 0 : i32
    %c0_i32_0 = arith.constant 0 : i32
    %c0_i32_1 = arith.constant 0 : i32
    return %arg0, %c0_i32, %c0_i32_0 : i32, i32, i32
  }
}

</mosaic_0001>

<bundles_post_ra>
// kernel: tpu_custom_call.1
= control target key start
LH: loop header
LB: loop body
LE: loop exit
PB: predicated region body
PF: predicated region fallthrough
CT: control target
= control target key end

     0   :  { %8 = vsyncpa [#allocation3], 0  ;;  %s284_s0 = inlined_call_operand.hbm [shape: f32[9,128], index: 0, kind: input, shape index: {}]   ;;  %s285_s1 = inlined_call_operand.hbm [shape: f32[9,128], index: 1, kind: input, shape index: {}]   ;;  %s286_s2 = inlined_call_operand.hbm [shape: f32[9,128], index: 2, kind: input, shape index: {}]   ;;  %s287_s3 = inlined_call_operand.hbm [shape: f32[1,2,128], index: 3, kind: output, shape index: {}]  }
   0x1   :  { %9 = vsyncpa [#allocation6], 0 }
   0x2   :  { %10 = vsyncpa [#allocation4], 0  ;;  %s196_s12 = smov [#allocation5]   ;;  %s197_s14 = smov [#allocation2]  }
   0x3   :  { %s27_s13 = sshll.u32 %s196_s12, 4  ;;  %s17_s15 = sshll.u32 %s197_s14, 4  ;;  %s28_s13 = int_to_ptr.vmem [resolvable:$true] %s27_s13  ;;  %s220_s15 = int_to_ptr.vmem [resolvable:$true] %s17_s15 }
   0x4   :  { %s102_s18 = scalar_lea.hbm %s285_s1, 128  ;;  %s104_s23 = scalar_lea.hbm %s285_s1, 256 }
   0x5   :  { %p103_p0 = scmp.ne.s32.totalorder %s285_s1, %s102_s18  ;;  %p105_p1 = scmp.lt.u32.totalorder %s104_s23, %s102_s18 }
   0x6   :  { %p106_p2 = scmp.lt.u32.totalorder %s102_s18, %s285_s1 }
   0x8   :  { %p107_p3 = por %p106_p2, %p105_p1 }
   0xa   :  { %p108_p4 = pnand %p107_p3, %p103_p0 }
   0xc   :  { %111 = shalt.err (!%p108_p4)
}
   0xd   :  { %s112_s26 = scalar_lea.vmem %s28_s13, 128  ;;  %p117_p6 = scmp.lt.s32.totalorder %s28_s13, %s28_s13 }
   0xe   :  { %p113_p5 = scmp.ne.s32.totalorder %s28_s13, %s112_s26  ;;  %p118_p7 = scmp.lt.s32.totalorder %s112_s26, %s112_s26 }
  0x10   :  { %p119_p8 = por %p118_p7, %p117_p6 }
  0x12   :  { %p120_p9 = pnand %p119_p8, %p113_p5 }
  0x14   :  { %123 = shalt.err (!%p120_p9)
}
  0x15   :  { %30 = dma.hbm_to_vmem [thread:$0]  %s285_s1, 128, %s28_s13, [#allocation6]  }
  0x16   :  { %s124_s4 = scalar_lea.hbm %s284_s0, 128  ;;  %s126_s9 = scalar_lea.hbm %s284_s0, 256 }
  0x17   :  { %p125_p10 = scmp.ne.s32.totalorder %s284_s0, %s124_s4  ;;  %p127_p11 = scmp.lt.u32.totalorder %s126_s9, %s124_s4 }
  0x18   :  { %p128_p12 = scmp.lt.u32.totalorder %s124_s4, %s284_s0 }
  0x1a   :  { %p129_p13 = por %p128_p12, %p127_p11 }
  0x1c   :  { %p130_p0 = pnand %p129_p13, %p125_p10 }
  0x1e   :  { %133 = shalt.err (!%p130_p0)
}
  0x1f   :  { %s134_s1 = scalar_lea.vmem %s220_s15, 128  ;;  %p139_p2 = scmp.lt.s32.totalorder %s220_s15, %s220_s15 }
  0x20   :  { %p135_p1 = scmp.ne.s32.totalorder %s220_s15, %s134_s1  ;;  %p140_p3 = scmp.lt.s32.totalorder %s134_s1, %s134_s1 }
  0x22   :  { %p141_p4 = por %p140_p3, %p139_p2 }
  0x24   :  { %p142_p5 = pnand %p141_p4, %p135_p1 }
  0x26   :  { %145 = shalt.err (!%p142_p5)
}
  0x27   :  { %20 = dma.hbm_to_vmem [thread:$0]  %s284_s0, 128, %s220_s15, [#allocation3]  }
  0x28   :  { %s198_s14 = smov [#allocation7]   ;;  %s146_s19 = scalar_lea.hbm %s286_s2, 128 }
  0x29   :  { %s37_s16 = sshll.u32 %s198_s14, 4  ;;  %p147_p6 = scmp.ne.s32.totalorder %s286_s2, %s146_s19  ;;  %s38_s16 = int_to_ptr.vmem [resolvable:$true] %s37_s16 }
  0x2a   :  { %s148_s24 = scalar_lea.hbm %s286_s2, 256  ;;  %p150_p8 = scmp.lt.u32.totalorder %s146_s19, %s286_s2 }
  0x2b   :  { %p149_p7 = scmp.lt.u32.totalorder %s148_s24, %s146_s19 }
  0x2d   :  { %p151_p9 = por %p150_p8, %p149_p7 }
  0x2f   :  { %p152_p10 = pnand %p151_p9, %p147_p6 }
  0x31   :  { %155 = shalt.err (!%p152_p10)
}
  0x32   :  { %s156_s0 = scalar_lea.vmem %s38_s16, 128  ;;  %p161_p12 = scmp.lt.s32.totalorder %s38_s16, %s38_s16 }
  0x33   :  { %p157_p11 = scmp.ne.s32.totalorder %s38_s16, %s156_s0  ;;  %p162_p13 = scmp.lt.s32.totalorder %s156_s0, %s156_s0 }
  0x35   :  { %p163_p0 = por %p162_p13, %p161_p12 }
  0x37   :  { %p164_p1 = pnand %p163_p0, %p157_p11 }
  0x39   :  { %167 = shalt.err (!%p164_p1)
}
  0x3a   :  { %40 = dma.hbm_to_vmem [thread:$0]  %s286_s2, 128, %s38_s16, [#allocation6]  }
  0x3b   :  { %190 = dma.done.wait [#allocation3], 128  }
  0x3c   :  { %191 = vsyncadd [#allocation3], 4294967168 }
  0x3d   :  { %192 = dma.done.wait [#allocation6], 256  }
  0x3e   :  { %193 = vsyncadd [#allocation6], 4294967040  ;;  %v50_v0 = vld [vmem:[#allocation2] sm:$0xff]  ;;  %v51_v1 = vld [vmem:[#allocation5] sm:$0xff]  ;;  %s199_s2 = smov [#allocation8]  }
  0x3f   :  { %v52_v2 = vld [vmem:[#allocation7] sm:$0xff]  ;;  %v53_v3 = vsub.f32 %v50_v0, %v51_v1  ;;  %v60_v4 = vand.u32 2147483647, %v51_v1  ;;  %s87_s28 = sshll.u32 %s199_s2, 4  ;;  %s88_s28 = int_to_ptr.vmem [resolvable:$true] %s87_s28 }
  0x40   :  { %v74_v5 = vrot.slane %v52_v2, 4  ;;  %vm64_vm1 = vcmp.ne.f32.partialorder %v52_v2, 0.0  ;;  %s168_s29 = scalar_lea.vmem %s88_s28, 32  ;;  %p173_p3 = scmp.lt.s32.totalorder %s88_s28, %s88_s28 }
  0x41   :  { %v54_v6 = vand.u32 2147483647, %v53_v3  ;;  %v56_v7 = vmul.f32 0.5, %v53_v3  ;;  %v61_v8 = vmul.f32 0.02, %v60_v4  ;;  %p169_p2 = scmp.ne.s32.totalorder %s88_s28, %s168_s29  ;;  %p174_p4 = scmp.lt.s32.totalorder %s168_s29, %s168_s29 }
  0x42   :  { %v75_v9 = vadd.f32 %v74_v5, %v52_v2 }
  0x43   :  { %vm55_vm0 = vcmp.le.f32.partialorder %v54_v6, 1.0  ;;  %v57_v10 = vmul.f32 %v56_v7, %v53_v3  ;;  %v97_v11 = vadd.f32 -0.5, %v54_v6  ;;  %v62_v12 = vadd.f32 1.0, %v61_v8  ;;  %p175_p5 = por %p174_p4, %p173_p3 }
  0x44   :  { %v76_v13 = vrot.slane %v75_v9, 2 }
  0x45   :  { %v59_v14 = vsel %vm55_vm0, %v57_v10, %v97_v11  ;;  %p176_p6 = pnand %p175_p5, %p169_p2 }
  0x46   :  { %v63_v15 = vmul.f32 %v62_v12, %v59_v14  ;;  %v77_v16 = vadd.f32 %v76_v13, %v75_v9 }
  0x48   :  { %v65_v17 = vmul.f32 %v63_v15, %v52_v2  ;;  %v78_v18 = vrot.slane %v77_v16, 1 }
  0x4a   :  { %v66_v19 = vsel %vm64_vm1, %v65_v17, 0.0  ;;  %v79_v20 = vadd.f32 %v78_v18, %v77_v16 }
  0x4b   :  { %v67_v21 = vrot.slane %v66_v19, 4 }
  0x4c   :  { %80 = vst [vmem:[#allocation8 + $0x1] sm:$0x1] %v79_v20 }
  0x4d   :  { %v68_v22 = vadd.f32 %v67_v21, %v66_v19 }
  0x4f   :  { %v69_v23 = vrot.slane %v68_v22, 2 }
  0x51   :  { %v70_v24 = vadd.f32 %v69_v23, %v68_v22 }
  0x53   :  { %v71_v25 = vrot.slane %v70_v24, 1 }
  0x55   :  { %v72_v26 = vadd.f32 %v71_v25, %v70_v24 }
  0x57   :  { %73 = vst [vmem:[#allocation8] sm:$0x1] %v72_v26 }
  0x58   :  { %179 = shalt.err (!%p176_p6)
}
  0x59   :  { %s180_s5 = scalar_lea.hbm %s287_s3, 32 }
  0x5a   :  { %p181_p7 = scmp.ne.s32.totalorder %s287_s3, %s180_s5  ;;  %p184_p8 = scmp.lt.u32.totalorder %s180_s5, %s287_s3 }
  0x5c   :  { %p186_p9 = pnand %p184_p8, %p181_p7 }
  0x5e   :  { %189 = shalt.err (!%p186_p9)
}
  0x5f   :  { %90 = dma.vmem_to_hbm [thread:$0]  %s88_s28, 32, %s287_s3, [#allocation4]  }
  0x60   :  { %194 = dma.done.wait [#allocation4], 32  }
  0x61   :  { %195 = vsyncadd [#allocation4], 4294967264 }
  0x62   :  { %94 = vsyncpa [#allocation3], 1 }
  0x63   :  { %95 = vsyncpa [#allocation6], 1 }
  0x64   :  { %96 = vsyncpa [#allocation4], 1 }

</bundles_post_ra>
